<compile_context>
chip_gen: v6e
topology: v6e:2x2x1
jax: 0.10.0
libtpu: 0.0.40
codegen_flags: <defaults>
</compile_context>

<pallas_src>
import functools
import math

import jax
import jax.numpy as jnp
from jax.experimental import pallas as pl
from jax.experimental.pallas import tpu as pltpu


def _round_up(x, m):
    return ((x + m - 1) // m) * m


# Static (per-process) choice: shard N across the two TensorCores only on v7x.
try:
    _IS_V7X = "v7" in jax.devices()[0].device_kind.lower()
except Exception:  # pragma: no cover - defensive; default to single-TC path
    _IS_V7X = False


def _fnn5_kernel(x_ref, w_ref, b_ref, out_ref):
    # out = x @ w + b ; bf16 operands, f32 accumulation on the MXU.
    out_ref[...] = (
        jnp.dot(x_ref[...], w_ref[...], preferred_element_type=jnp.float32)
        + b_ref[...]
    )


def init_params(key, context_len=21, in_dim=50, hidden_dim=500):
    """Matches nn.Linear(context_len*in_dim, hidden_dim) default init
    (uniform(-k, k), k = 1/sqrt(fan_in)); weight stored transposed as
    [fan_in, hidden_dim].  Padded / bf16-cast copies are built ONCE here so the
    per-call path never re-pads or re-casts the 2+ MiB weight."""
    fan_in = context_len * in_dim
    k = 1.0 / math.sqrt(fan_in)
    kw, kb = jax.random.split(key)
    w = jax.random.uniform(kw, (fan_in, hidden_dim), jnp.float32, -k, k)
    b = jax.random.uniform(kb, (hidden_dim,), jnp.float32, -k, k)

    # Pad K, N to lane multiples (N also to a multiple of 2*128 on v7x so it
    # splits evenly across the two TensorCores).  Zero-padding K is exact.
    Kp = _round_up(fan_in, 128)
    Np = _round_up(hidden_dim, 256 if _IS_V7X else 128)
    w_p = (
        jnp.zeros((Kp, Np), jnp.bfloat16)
        .at[:fan_in, :hidden_dim]
        .set(w.astype(jnp.bfloat16))
    )
    b_p = jnp.zeros((1, Np), jnp.float32).at[0, :hidden_dim].set(b)
    return {"w": w, "b": b, "w_p": w_p, "b_p": b_p}


@functools.partial(jax.jit, static_argnames=("n_out",))
def fnn5_forward(x, w_p, b_p, n_out):
    """x: [sentence_len, context_len, in_dim] -> [sentence_len, n_out]."""
    S, C, D = x.shape
    K = C * D
    Kp, Np = w_p.shape
    assert Kp >= K and Np >= n_out, (Kp, K, Np, n_out)
    Mp = _round_up(S, 8)  # min sublane pad only; kernel is bandwidth-bound

    # The PyTorch .view(sentence_len, -1): wrapper-side layout plumbing.
    # Only the tiny activation is padded/cast per call.
    x2 = x.reshape(S, K).astype(jnp.bfloat16)
    x_p = jnp.zeros((Mp, Kp), jnp.bfloat16).at[:S, :K].set(x2)

    cost = pl.CostEstimate(
        flops=2 * Mp * Kp * Np,
        transcendentals=0,
        bytes_accessed=Mp * Kp * 2 + Kp * Np * 2 + Np * 4 + Mp * Np * 4,
    )

    if _IS_V7X:
        # v7x: 2 TensorCores/chip -> split N so each core moves half the weight.
        n_blk = Np // 2
        out_p = pl.pallas_call(
            _fnn5_kernel,
            out_shape=jax.ShapeDtypeStruct((Mp, Np), jnp.float32),
            grid=(2,),
            in_specs=[
                pl.BlockSpec((Mp, Kp), lambda j: (0, 0)),      # x resident
                pl.BlockSpec((Kp, n_blk), lambda j: (0, j)),   # W advances with j
                pl.BlockSpec((1, n_blk), lambda j: (0, j)),    # b advances with j
            ],
            out_specs=pl.BlockSpec((Mp, n_blk), lambda j: (0, j)),
            compiler_params=pltpu.CompilerParams(
                dimension_semantics=("parallel",)
            ),
            cost_estimate=cost,
        )(x_p, w_p, b_p)
    else:
        # v5e / v6e: single TensorCore -> one whole-array call, no grid overhead.
        out_p = pl.pallas_call(
            _fnn5_kernel,
            out_shape=jax.ShapeDtypeStruct((Mp, Np), jnp.float32),
            in_specs=[pl.BlockSpec(memory_space=pltpu.MemorySpace.VMEM)] * 3,
            out_specs=pl.BlockSpec(memory_space=pltpu.MemorySpace.VMEM),
            cost_estimate=cost,
        )(x_p, w_p, b_p)

    # Slice the padding back off outside the kernel.
    return out_p[:S, :n_out]


# ----------------------- pure-JAX references (for checking) -----------------
def fnn5_ref_f32(x, w, b):
    S = x.shape[0]
    return x.reshape(S, -1) @ w + b


def fnn5_ref_bf16(x, w, b):
    # Same bf16 quantization of x / w as the kernel, f32 accumulation.
    S = x.shape[0]
    x2 = x.reshape(S, -1).astype(jnp.bfloat16).astype(jnp.float32)
    wq = w.astype(jnp.bfloat16).astype(jnp.float32)
    return x2 @ wq + b


if __name__ == "__main__":
    # Shapes implied by the module defaults (sentence axis kept small).
    SENT_LEN, CONTEXT_LEN, IN_DIM, HIDDEN = 8, 21, 50, 500

    key = jax.random.PRNGKey(0)
    pkey, xkey = jax.random.split(key)
    params = init_params(pkey, CONTEXT_LEN, IN_DIM, HIDDEN)
    x = jax.random.normal(xkey, (SENT_LEN, CONTEXT_LEN, IN_DIM), jnp.float32)

    out = fnn5_forward(x, params["w_p"], params["b_p"], HIDDEN)
    jax.block_until_ready(out)
    assert out.shape == (SENT_LEN, HIDDEN), out.shape

    # Tight check against a reference with identical bf16 weight/activation
    # quantization (verifies the kernel matmul itself).
    ref_q = fnn5_ref_bf16(x, params["w"], params["b"])
    max_err_q = float(jnp.max(jnp.abs(out - ref_q)))
    assert jnp.allclose(out, ref_q, atol=2e-3, rtol=2e-3), f"max_err_q={max_err_q}"

    # Looser check against the full-f32 module semantics (bf16 weight storage
    # is an intentional bandwidth optimization).
    ref = fnn5_ref_f32(x, params["w"], params["b"])
    max_err = float(jnp.max(jnp.abs(out - ref)))
    assert jnp.allclose(out, ref, atol=3e-2, rtol=3e-2), f"max_err={max_err}"

    print("KERNEL_OK")
</pallas_src>

<mosaic_0001>
module attributes {stable_mosaic.version = 11 : i64} {
  func.func @_fnn5_kernel(%arg0: memref<8x1152xbf16, #tpu.memory_space<vmem>>, %arg1: memref<1152x512xbf16, #tpu.memory_space<vmem>>, %arg2: memref<1x512xf32, #tpu.memory_space<vmem>>, %arg3: memref<8x512xf32, #tpu.memory_space<vmem>>) attributes {dimension_semantics = [], scalar_prefetch = 0 : i64, scratch_operands = 0 : i64, tpu.core_type = #tpu.core_type<tc>} {
    %c0 = arith.constant 0 : index
    %c0_0 = arith.constant 0 : index
    %0 = vector.load %arg0[%c0, %c0_0] : memref<8x1152xbf16, #tpu.memory_space<vmem>>, vector<8x1152xbf16>
    %c0_1 = arith.constant 0 : index
    %c0_2 = arith.constant 0 : index
    %1 = vector.load %arg1[%c0_1, %c0_2] : memref<1152x512xbf16, #tpu.memory_space<vmem>>, vector<1152x512xbf16>
    %cst = arith.constant dense<0.000000e+00> : vector<8x512xf32>
    %2 = tpu.matmul %0, %1, %cst {dimension_numbers = #tpu.dot_dimension_numbers<[1], [0], [0], [1], [0, 0, 1, 1], [], []>} : vector<8x1152xbf16>, vector<1152x512xbf16>, vector<8x512xf32> -> vector<8x512xf32>
    %c0_3 = arith.constant 0 : index
    %c0_4 = arith.constant 0 : index
    %3 = vector.load %arg2[%c0_3, %c0_4] : memref<1x512xf32, #tpu.memory_space<vmem>>, vector<1x512xf32>
    %4 = vector.broadcast %3 : vector<1x512xf32> to vector<8x512xf32>
    %5 = arith.addf %2, %4 : vector<8x512xf32>
    %c0_5 = arith.constant 0 : index
    %c0_6 = arith.constant 0 : index
    %6 = vector.load %arg3[%c0_5, %c0_6] : memref<8x512xf32, #tpu.memory_space<vmem>>, vector<8x512xf32>
    tpu.vector_store %arg3[%c0_5, %c0_6], %5 {strides = array<i32>} : memref<8x512xf32, #tpu.memory_space<vmem>>, vector<8x512xf32>,
    return
  }
}

</mosaic_0001>

<bundles_post_ra>
// kernel: fnn5_forward.1
= control target key start
LH: loop header
LB: loop body
LE: loop exit
PB: predicated region body
PF: predicated region fallthrough
CT: control target
= control target key end

     0   :  { %8 = vsyncpa [#allocation3], 0  ;;  %s3184_s0 = inlined_call_operand.vmem [shape: bf16[8,1152], index: 0, kind: input, shape index: {}]   ;;  %s3185_s1 = inlined_call_operand.hbm [shape: bf16[1152,512], index: 1, kind: input, shape index: {}]   ;;  %s3186_s2 = inlined_call_operand.hbm [shape: f32[1,512], index: 2, kind: input, shape index: {}]   ;;  %s3187_s3 = inlined_call_operand.hbm [shape: f32[8,512], index: 3, kind: output, shape index: {}]  }
   0x1   :  { %9 = vsyncpa [#allocation6], 0 }
   0x2   :  { %10 = vsyncpa [#allocation4], 0  ;;  %s3069_s12 = smov [#allocation2]  }
   0x3   :  { %s18_s13 = sshll.u32 %s3069_s12, 4  ;;  %s19_s13 = int_to_ptr.vmem [resolvable:$true] %s18_s13 }
   0x4   :  { %s3011_s14 = scalar_lea.vmem %s19_s13, 36864  ;;  %p3016_p1 = scmp.lt.s32.totalorder %s19_s13, %s19_s13 }
   0x5   :  { %p3012_p0 = scmp.ne.s32.totalorder %s19_s13, %s3011_s14  ;;  %p3017_p2 = scmp.lt.s32.totalorder %s3011_s14, %s3011_s14 }
   0x7   :  { %p3018_p3 = por %p3017_p2, %p3016_p1 }
   0x9   :  { %p3019_p4 = pnand %p3018_p3, %p3012_p0 }
   0xb   :  { %3022 = shalt.err (!%p3019_p4)
}
   0xc   :  { %s3070_s15 = smov 256   ;;  %s3071_s16 = smov 16  }
   0xd   :  { %24 = dma.hbm_to_vmem [thread:$0]  %s3185_s1, 36864, %s19_s13, [#allocation3], %s3070_s15, %s3070_s15, %s3071_s16  }
   0xe   :  { %s3072_s19 = smov [#allocation5]  }
   0xf   :  { %s31_s20 = sshll.u32 %s3072_s19, 4  ;;  %s32_s20 = int_to_ptr.vmem [resolvable:$true] %s31_s20 }
  0x10   :  { %s3031_s21 = scalar_lea.vmem %s32_s20, 64  ;;  %p3036_p6 = scmp.lt.s32.totalorder %s32_s20, %s32_s20 }
  0x11   :  { %p3032_p5 = scmp.ne.s32.totalorder %s32_s20, %s3031_s21  ;;  %p3037_p7 = scmp.lt.s32.totalorder %s3031_s21, %s3031_s21 }
  0x13   :  { %p3038_p8 = por %p3037_p7, %p3036_p6 }
  0x15   :  { %p3039_p9 = pnand %p3038_p8, %p3032_p5 }
  0x17   :  { %3042 = shalt.err (!%p3039_p9)
}
  0x18   :  { %34 = dma.hbm_to_vmem [thread:$0]  %s3186_s2, 64, %s32_s20, [#allocation6]  }
  0x19   :  { %3063 = dma.done.wait [#allocation3], 36864  }
  0x1a   :  { %3064 = vsyncadd [#allocation3], 4294930432 }
  0x1b   :  { %3065 = dma.done.wait [#allocation6], 64  }
  0x1c   :  { %3066 = vsyncadd [#allocation6], 4294967232  ;;  %v2562_v0 = vld [vmem:[#allocation2 + $0xe4] ss:$16 sps:$4 sm:$0xff]   ;;  %v2566_v2 = vld [vmem:[#allocation2 + $0xe0] ss:$16 sps:$4 sm:$0xff]  }
  0x1d   :  { %v2564_v1 = vld [vmem:[#allocation2 + $0x2e4] ss:$16 sps:$4 sm:$0xff]   ;;  %1829 = vmatprep.subr.bf16.mxu0 %v2562_v0  ;;  %v2567_v3 = vld [vmem:[#allocation2 + $0x2e0] ss:$16 sps:$4 sm:$0xff]   ;;  %v43_v48 = vld [vmem:[%s3184_s0 + $0x8] sm:$0xff] }
  0x1e   :  { %1870 = vmatprep.subr.bf16.mxu1 %v2564_v1  ;;  %v2568_v4 = vld [vmem:[#allocation2 + $0xc4] ss:$16 sps:$4 sm:$0xff]   ;;  %1830 = vmatpush1.bf16.msra.mxu0 %v2566_v2  ;;  %v2572_v6 = vld [vmem:[#allocation2 + $0xc0] ss:$16 sps:$4 sm:$0xff]   ;;  %v3109_v51 = vcombine.high %v43_v48, %v43_v48 }
  0x1f   :  { %1871 = vmatpush1.bf16.msra.mxu1 %v2567_v3  ;;  %v2570_v5 = vld [vmem:[#allocation2 + $0x2c4] ss:$16 sps:$4 sm:$0xff]   ;;  %1831 = vmatprep.subr.bf16.mxu0 %v2568_v4  ;;  %v2573_v7 = vld [vmem:[#allocation2 + $0x2c0] ss:$16 sps:$4 sm:$0xff]  }
  0x20   :  { %1872 = vmatprep.subr.bf16.mxu1 %v2570_v5  ;;  %v2574_v8 = vld [vmem:[#allocation2 + $0xa4] ss:$16 sps:$4 sm:$0xff]   ;;  %v2578_v10 = vld [vmem:[#allocation2 + $0xa0] ss:$16 sps:$4 sm:$0xff]   ;;  %1902 = vmatprep.mubr.bf16.mxu1 %v3109_v51 }
  0x21   :  { %v2576_v9 = vld [vmem:[#allocation2 + $0x2a4] ss:$16 sps:$4 sm:$0xff]   ;;  %v2579_v11 = vld [vmem:[#allocation2 + $0x2a0] ss:$16 sps:$4 sm:$0xff]  }
  0x22   :  { %1832 = vmatpush1.bf16.msra.mxu0 %v2572_v6  ;;  %v2580_v12 = vld [vmem:[#allocation2 + $0x84] ss:$16 sps:$4 sm:$0xff]   ;;  %v2584_v14 = vld [vmem:[#allocation2 + $0x80] ss:$16 sps:$4 sm:$0xff]  }
  0x23   :  { %1873 = vmatpush1.bf16.msra.mxu1 %v2573_v7  ;;  %1833 = vmatprep.subr.bf16.mxu0 %v2574_v8  ;;  %v2582_v13 = vld [vmem:[#allocation2 + $0x284] ss:$16 sps:$4 sm:$0xff]   ;;  %v2585_v15 = vld [vmem:[#allocation2 + $0x280] ss:$16 sps:$4 sm:$0xff]   ;;  %v3115_v7 = vcombine.low %v43_v48, %v43_v48 }
  0x24   :  { %1874 = vmatprep.subr.bf16.mxu1 %v2576_v9  ;;  %v2586_v16 = vld [vmem:[#allocation2 + $0x64] ss:$16 sps:$4 sm:$0xff]   ;;  %v2590_v18 = vld [vmem:[#allocation2 + $0x60] ss:$16 sps:$4 sm:$0xff]  }
  0x25   :  { %v2588_v17 = vld [vmem:[#allocation2 + $0x264] ss:$16 sps:$4 sm:$0xff]   ;;  %v2591_v19 = vld [vmem:[#allocation2 + $0x260] ss:$16 sps:$4 sm:$0xff]  }
  0x26   :  { %1834 = vmatpush1.bf16.msra.mxu0 %v2578_v10  ;;  %v2592_v20 = vld [vmem:[#allocation2 + $0x44] ss:$16 sps:$4 sm:$0xff]   ;;  %v2596_v22 = vld [vmem:[#allocation2 + $0x40] ss:$16 sps:$4 sm:$0xff]  }
  0x27   :  { %1875 = vmatpush1.bf16.msra.mxu1 %v2579_v11  ;;  %1835 = vmatprep.subr.bf16.mxu0 %v2580_v12  ;;  %v2594_v21 = vld [vmem:[#allocation2 + $0x244] ss:$16 sps:$4 sm:$0xff]   ;;  %v2597_v23 = vld [vmem:[#allocation2 + $0x240] ss:$16 sps:$4 sm:$0xff]  }
  0x28   :  { %1876 = vmatprep.subr.bf16.mxu1 %v2582_v13  ;;  %v2598_v24 = vld [vmem:[#allocation2 + $0x24] ss:$16 sps:$4 sm:$0xff]   ;;  %v2602_v26 = vld [vmem:[#allocation2 + $0x20] ss:$16 sps:$4 sm:$0xff]  }
  0x29   :  { %v2600_v25 = vld [vmem:[#allocation2 + $0x224] ss:$16 sps:$4 sm:$0xff]   ;;  %v2603_v27 = vld [vmem:[#allocation2 + $0x220] ss:$16 sps:$4 sm:$0xff]  }
  0x2a   :  { %1836 = vmatpush1.bf16.msra.mxu0 %v2584_v14  ;;  %v2604_v28 = vld [vmem:[#allocation2 + $0x4] ss:$16 sps:$4 sm:$0xff]   ;;  %v2608_v30 = vld [vmem:[#allocation2] ss:$16 sps:$4 sm:$0xff]  }
  0x2b   :  { %1877 = vmatpush1.bf16.msra.mxu1 %v2585_v15  ;;  %1837 = vmatprep.subr.bf16.mxu0 %v2586_v16  ;;  %v2606_v29 = vld [vmem:[#allocation2 + $0x204] ss:$16 sps:$4 sm:$0xff]   ;;  %v2609_v31 = vld [vmem:[#allocation2 + $0x200] ss:$16 sps:$4 sm:$0xff]  }
  0x2c   :  { %1878 = vmatprep.subr.bf16.mxu1 %v2588_v17  ;;  %v2610_v32 = vld [vmem:[#allocation2 + $0x1e4] ss:$16 sps:$4 sm:$0xff]   ;;  %v2614_v34 = vld [vmem:[#allocation2 + $0x1e0] ss:$16 sps:$4 sm:$0xff]  }
  0x2d   :  { %v2612_v33 = vld [vmem:[#allocation2 + $0x3e4] ss:$16 sps:$4 sm:$0xff]   ;;  %v2615_v35 = vld [vmem:[#allocation2 + $0x3e0] ss:$16 sps:$4 sm:$0xff]  }
  0x2e   :  { %1838 = vmatpush1.bf16.msra.mxu0 %v2590_v18  ;;  %v2616_v36 = vld [vmem:[#allocation2 + $0x1c4] ss:$16 sps:$4 sm:$0xff]   ;;  %v2620_v38 = vld [vmem:[#allocation2 + $0x1c0] ss:$16 sps:$4 sm:$0xff]  }
  0x2f   :  { %1879 = vmatpush1.bf16.msra.mxu1 %v2591_v19  ;;  %1839 = vmatprep.subr.bf16.mxu0 %v2592_v20  ;;  %v2618_v37 = vld [vmem:[#allocation2 + $0x3c4] ss:$16 sps:$4 sm:$0xff]   ;;  %v2621_v39 = vld [vmem:[#allocation2 + $0x3c0] ss:$16 sps:$4 sm:$0xff]  }
  0x30   :  { %1880 = vmatprep.subr.bf16.mxu1 %v2594_v21  ;;  %v2622_v40 = vld [vmem:[#allocation2 + $0x1a4] ss:$16 sps:$4 sm:$0xff]   ;;  %v2626_v42 = vld [vmem:[#allocation2 + $0x1a0] ss:$16 sps:$4 sm:$0xff]  }
  0x31   :  { %v2624_v41 = vld [vmem:[#allocation2 + $0x3a4] ss:$16 sps:$4 sm:$0xff]   ;;  %v2627_v43 = vld [vmem:[#allocation2 + $0x3a0] ss:$16 sps:$4 sm:$0xff]  }
  0x32   :  { %1840 = vmatpush1.bf16.msra.mxu0 %v2596_v22  ;;  %v2628_v44 = vld [vmem:[#allocation2 + $0x184] ss:$16 sps:$4 sm:$0xff]   ;;  %v2632_v49 = vld [vmem:[#allocation2 + $0x180] ss:$16 sps:$4 sm:$0xff]  }
  0x33   :  { %1881 = vmatpush1.bf16.msra.mxu1 %v2597_v23  ;;  %1841 = vmatprep.subr.bf16.mxu0 %v2598_v24  ;;  %v2630_v45 = vld [vmem:[#allocation2 + $0x384] ss:$16 sps:$4 sm:$0xff]   ;;  %v2633_v50 = vld [vmem:[#allocation2 + $0x380] ss:$16 sps:$4 sm:$0xff]  }
  0x34   :  { %1882 = vmatprep.subr.bf16.mxu1 %v2600_v25  ;;  %v42_v46 = vld [vmem:[%s3184_s0] sm:$0xff] }
  0x35   :  { %v3104_v47 = vcombine.high %v42_v46, %v42_v46  ;;  %v2634_v52 = vld [vmem:[#allocation2 + $0x164] ss:$16 sps:$4 sm:$0xff]   ;;  %v2638_v54 = vld [vmem:[#allocation2 + $0x160] ss:$16 sps:$4 sm:$0xff]   ;;  %v3113_v6 = vcombine.low %v42_v46, %v42_v46 }
  0x36   :  { %1842 = vmatpush1.bf16.msra.mxu0 %v2602_v26  ;;  %v2636_v53 = vld [vmem:[#allocation2 + $0x364] ss:$16 sps:$4 sm:$0xff]   ;;  %v2639_v55 = vld [vmem:[#allocation2 + $0x360] ss:$16 sps:$4 sm:$0xff]  }
  0x37   :  { %1883 = vmatpush1.bf16.msra.mxu1 %v2603_v27  ;;  %1843 = vmatprep.subr.bf16.mxu0 %v2604_v28  ;;  %v2640_v56 = vld [vmem:[#allocation2 + $0x144] ss:$16 sps:$4 sm:$0xff]   ;;  %v2644_v58 = vld [vmem:[#allocation2 + $0x140] ss:$16 sps:$4 sm:$0xff]  }
  0x38   :  { %1884 = vmatprep.subr.bf16.mxu1 %v2606_v29  ;;  %1861 = vmatprep.mubr.bf16.mxu0 %v3104_v47  ;;  %v2642_v57 = vld [vmem:[#allocation2 + $0x344] ss:$16 sps:$4 sm:$0xff]   ;;  %v2645_v59 = vld [vmem:[#allocation2 + $0x340] ss:$16 sps:$4 sm:$0xff]  }
  0x39   :  { %v2646_v60 = vld [vmem:[#allocation2 + $0x124] ss:$16 sps:$4 sm:$0xff]   ;;  %v2650_v62 = vld [vmem:[#allocation2 + $0x120] ss:$16 sps:$4 sm:$0xff]  }
  0x3a   :  { %1844 = vmatpush1.bf16.msra.mxu0 %v2608_v30  ;;  %v2648_v61 = vld [vmem:[#allocation2 + $0x324] ss:$16 sps:$4 sm:$0xff]   ;;  %v2651_v63 = vld [vmem:[#allocation2 + $0x320] ss:$16 sps:$4 sm:$0xff]  }
  0x3b   :  { %1885 = vmatpush1.bf16.msra.mxu1 %v2609_v31  ;;  %1845 = vmatprep.subr.bf16.mxu0 %v2610_v32  ;;  %v2652_v0 = vld [vmem:[#allocation2 + $0x104] ss:$16 sps:$4 sm:$0xff]   ;;  %v2656_v2 = vld [vmem:[#allocation2 + $0x100] ss:$16 sps:$4 sm:$0xff]  }
  0x3c   :  { %1886 = vmatprep.subr.bf16.mxu1 %v2612_v33  ;;  %v2654_v1 = vld [vmem:[#allocation2 + $0x304] ss:$16 sps:$4 sm:$0xff]   ;;  %v2657_v3 = vld [vmem:[#allocation2 + $0x300] ss:$16 sps:$4 sm:$0xff]   ;;  %v3127_v33 = vld [vmem:[%s3184_s0 + $0x18] sm:$0xff] }
  0x3d   :  { %v2664_v4 = vld [vmem:[#allocation2 + $0x4e4] ss:$16 sps:$4 sm:$0xff]   ;;  %v2662_v8 = vld [vmem:[#allocation2 + $0x4e0] ss:$16 sps:$4 sm:$0xff]  }
  0x3e   :  { %1846 = vmatpush2.bf16.msra.mxu0 %v2614_v34  ;;  %v2667_v5 = vld [vmem:[#allocation2 + $0x6e4] ss:$16 sps:$4 sm:$0xff]   ;;  %v2665_v9 = vld [vmem:[#allocation2 + $0x6e0] ss:$16 sps:$4 sm:$0xff]  }
  0x3f   :  { %1887 = vmatpush2.bf16.msra.mxu1 %v2615_v35  ;;  %1847 = vmatprep.subr.bf16.mxu0 %v2616_v36  ;;  %v2670_v10 = vld [vmem:[#allocation2 + $0x4c4] ss:$16 sps:$4 sm:$0xff]   ;;  %v2668_v12 = vld [vmem:[#allocation2 + $0x4c0] ss:$16 sps:$4 sm:$0xff]  }
  0x40   :  { %1888 = vmatprep.subr.bf16.mxu1 %v2618_v37  ;;  %v2673_v11 = vld [vmem:[#allocation2 + $0x6c4] ss:$16 sps:$4 sm:$0xff]   ;;  %v2671_v13 = vld [vmem:[#allocation2 + $0x6c0] ss:$16 sps:$4 sm:$0xff]   ;;  %v3135_v37 = vcombine.high %v3127_v33, %v3127_v33 }
  0x41   :  { %v2676_v14 = vld [vmem:[#allocation2 + $0x4a4] ss:$16 sps:$4 sm:$0xff]   ;;  %v2674_v16 = vld [vmem:[#allocation2 + $0x4a0] ss:$16 sps:$4 sm:$0xff]  }
  0x42   :  { %1848 = vmatpush2.bf16.msra.mxu0 %v2620_v38  ;;  %v2679_v15 = vld [vmem:[#allocation2 + $0x6a4] ss:$16 sps:$4 sm:$0xff]   ;;  %v2677_v17 = vld [vmem:[#allocation2 + $0x6a0] ss:$16 sps:$4 sm:$0xff]  }
  0x43   :  { %1889 = vmatpush2.bf16.msra.mxu1 %v2621_v39  ;;  %1849 = vmatprep.subr.bf16.mxu0 %v2622_v40  ;;  %v2682_v18 = vld [vmem:[#allocation2 + $0x484] ss:$16 sps:$4 sm:$0xff]   ;;  %v2680_v20 = vld [vmem:[#allocation2 + $0x480] ss:$16 sps:$4 sm:$0xff]  }
  0x44   :  { %1890 = vmatprep.subr.bf16.mxu1 %v2624_v41  ;;  %v2685_v19 = vld [vmem:[#allocation2 + $0x684] ss:$16 sps:$4 sm:$0xff]   ;;  %v2683_v21 = vld [vmem:[#allocation2 + $0x680] ss:$16 sps:$4 sm:$0xff]  }
  0x45   :  { %v2688_v22 = vld [vmem:[#allocation2 + $0x464] ss:$16 sps:$4 sm:$0xff]   ;;  %v2686_v24 = vld [vmem:[#allocation2 + $0x460] ss:$16 sps:$4 sm:$0xff]  }
  0x46   :  { %1850 = vmatpush2.bf16.msra.mxu0 %v2626_v42  ;;  %v2691_v23 = vld [vmem:[#allocation2 + $0x664] ss:$16 sps:$4 sm:$0xff]   ;;  %v2689_v25 = vld [vmem:[#allocation2 + $0x660] ss:$16 sps:$4 sm:$0xff]  }
  0x47   :  { %1891 = vmatpush2.bf16.msra.mxu1 %v2627_v43  ;;  %1851 = vmatprep.subr.bf16.mxu0 %v2628_v44  ;;  %v2694_v26 = vld [vmem:[#allocation2 + $0x444] ss:$16 sps:$4 sm:$0xff]   ;;  %v2692_v28 = vld [vmem:[#allocation2 + $0x440] ss:$16 sps:$4 sm:$0xff]  }
  0x48   :  { %1892 = vmatprep.subr.bf16.mxu1 %v2630_v45  ;;  %v2697_v27 = vld [vmem:[#allocation2 + $0x644] ss:$16 sps:$4 sm:$0xff]   ;;  %v2695_v29 = vld [vmem:[#allocation2 + $0x640] ss:$16 sps:$4 sm:$0xff]  }
  0x49   :  { %v2700_v30 = vld [vmem:[#allocation2 + $0x424] ss:$16 sps:$4 sm:$0xff]   ;;  %v2698_v34 = vld [vmem:[#allocation2 + $0x420] ss:$16 sps:$4 sm:$0xff]  }
  0x4a   :  { %1852 = vmatpush2.bf16.msra.mxu0 %v2632_v49  ;;  %v2703_v31 = vld [vmem:[#allocation2 + $0x624] ss:$16 sps:$4 sm:$0xff]   ;;  %v2701_v35 = vld [vmem:[#allocation2 + $0x620] ss:$16 sps:$4 sm:$0xff]  }
  0x4b   :  { %1893 = vmatpush2.bf16.msra.mxu1 %v2633_v50  ;;  %1853 = vmatprep.subr.bf16.mxu0 %v2634_v52  ;;  %v3122_v32 = vld [vmem:[%s3184_s0 + $0x10] sm:$0xff] }
  0x4c   :  { %1894 = vmatprep.subr.bf16.mxu1 %v2636_v53  ;;  %v3131_v36 = vcombine.high %v3122_v32, %v3122_v32  ;;  %v2706_v38 = vld [vmem:[#allocation2 + $0x404] ss:$16 sps:$4 sm:$0xff]   ;;  %v2704_v40 = vld [vmem:[#allocation2 + $0x400] ss:$16 sps:$4 sm:$0xff]  }
  0x4d   :  { %v2709_v39 = vld [vmem:[#allocation2 + $0x604] ss:$16 sps:$4 sm:$0xff]   ;;  %v2707_v41 = vld [vmem:[#allocation2 + $0x600] ss:$16 sps:$4 sm:$0xff]  }
  0x4e   :  { %1854 = vmatpush2.bf16.msra.mxu0 %v2638_v54  ;;  %v2712_v42 = vld [vmem:[#allocation2 + $0x5e4] ss:$16 sps:$4 sm:$0xff]   ;;  %v2710_v44 = vld [vmem:[#allocation2 + $0x5e0] ss:$16 sps:$4 sm:$0xff]  }
  0x4f   :  { %1895 = vmatpush2.bf16.msra.mxu1 %v2639_v55  ;;  %1855 = vmatprep.subr.bf16.mxu0 %v2640_v56  ;;  %v2715_v43 = vld [vmem:[#allocation2 + $0x7e4] ss:$16 sps:$4 sm:$0xff]   ;;  %v2713_v45 = vld [vmem:[#allocation2 + $0x7e0] ss:$16 sps:$4 sm:$0xff]  }
  0x50   :  { %1896 = vmatprep.subr.bf16.mxu1 %v2642_v57  ;;  %v2718_v46 = vld [vmem:[#allocation2 + $0x5c4] ss:$16 sps:$4 sm:$0xff]   ;;  %v2716_v49 = vld [vmem:[#allocation2 + $0x5c0] ss:$16 sps:$4 sm:$0xff]  }
  0x51   :  { %v2721_v48 = vld [vmem:[#allocation2 + $0x7c4] ss:$16 sps:$4 sm:$0xff]   ;;  %v2719_v50 = vld [vmem:[#allocation2 + $0x7c0] ss:$16 sps:$4 sm:$0xff]  }
  0x52   :  { %1856 = vmatpush2.bf16.msra.mxu0 %v2644_v58  ;;  %v2724_v52 = vld [vmem:[#allocation2 + $0x5a4] ss:$16 sps:$4 sm:$0xff]   ;;  %v2722_v54 = vld [vmem:[#allocation2 + $0x5a0] ss:$16 sps:$4 sm:$0xff]  }
  0x53   :  { %1897 = vmatpush2.bf16.msra.mxu1 %v2645_v59  ;;  %1857 = vmatprep.subr.bf16.mxu0 %v2646_v60  ;;  %v2727_v53 = vld [vmem:[#allocation2 + $0x7a4] ss:$16 sps:$4 sm:$0xff]   ;;  %v2725_v55 = vld [vmem:[#allocation2 + $0x7a0] ss:$16 sps:$4 sm:$0xff]  }
  0x54   :  { %1898 = vmatprep.subr.bf16.mxu1 %v2648_v61  ;;  %v2730_v56 = vld [vmem:[#allocation2 + $0x584] ss:$16 sps:$4 sm:$0xff]   ;;  %v2728_v58 = vld [vmem:[#allocation2 + $0x580] ss:$16 sps:$4 sm:$0xff]  }
  0x55   :  { %v2733_v57 = vld [vmem:[#allocation2 + $0x784] ss:$16 sps:$4 sm:$0xff]   ;;  %v2731_v59 = vld [vmem:[#allocation2 + $0x780] ss:$16 sps:$4 sm:$0xff]  }
  0x56   :  { %1858 = vmatpush2.bf16.msra.mxu0 %v2650_v62  ;;  %v2736_v60 = vld [vmem:[#allocation2 + $0x564] ss:$16 sps:$4 sm:$0xff]   ;;  %v2734_v62 = vld [vmem:[#allocation2 + $0x560] ss:$16 sps:$4 sm:$0xff]  }
  0x57   :  { %1899 = vmatpush2.bf16.msra.mxu1 %v2651_v63  ;;  %1859 = vmatprep.subr.bf16.mxu0 %v2652_v0  ;;  %v2739_v61 = vld [vmem:[#allocation2 + $0x764] ss:$16 sps:$4 sm:$0xff]   ;;  %v2737_v63 = vld [vmem:[#allocation2 + $0x760] ss:$16 sps:$4 sm:$0xff]  }
  0x58   :  { %1900 = vmatprep.subr.bf16.mxu1 %v2654_v1  ;;  %v2742_v0 = vld [vmem:[#allocation2 + $0x544] ss:$16 sps:$4 sm:$0xff]  }
  0x59   :  { %v2745_v1 = vld [vmem:[#allocation2 + $0x744] ss:$16 sps:$4 sm:$0xff]  }
  0x5a   :  { %1860 = vmatpush2.bf16.msra.mxu0 %v2656_v2  ;;  %v2740_v2 = vld [vmem:[#allocation2 + $0x540] ss:$16 sps:$4 sm:$0xff]  }
  0x5b   :  { %1901 = vmatpush2.bf16.msra.mxu1 %v2657_v3  ;;  %1911 = vmatprep.subr.bf16.mxu0 %v2664_v4  ;;  %v2743_v3 = vld [vmem:[#allocation2 + $0x740] ss:$16 sps:$4 sm:$0xff]   ;;  %v2748_v4 = vld [vmem:[#allocation2 + $0x524] ss:$16 sps:$4 sm:$0xff]  }
  0x5c   :  { %1952 = vmatprep.subr.bf16.mxu1 %v2667_v5  ;;  %v2751_v5 = vld [vmem:[#allocation2 + $0x724] ss:$16 sps:$4 sm:$0xff]  }
  0x5d   :  { %1862 = vmatmul.mubr.bf16.vlgmr.msra.gmra.mxu0 %v3113_v6 }
  0x5e   :  { %1903 = vmatmul.mubr.bf16.vlgmr.msra.gmra.mxu1 %v3115_v7  ;;  %1912 = vmatpush1.bf16.msra.mxu0 %v2662_v8  ;;  %v2746_v8 = vld [vmem:[#allocation2 + $0x520] ss:$16 sps:$4 sm:$0xff]  }
  0x5f   :  { %1953 = vmatpush1.bf16.msra.mxu1 %v2665_v9  ;;  %1913 = vmatprep.subr.bf16.mxu0 %v2670_v10  ;;  %v2749_v9 = vld [vmem:[#allocation2 + $0x720] ss:$16 sps:$4 sm:$0xff]   ;;  %v2754_v10 = vld [vmem:[#allocation2 + $0x504] ss:$16 sps:$4 sm:$0xff]  }
  0x60   :  { %1954 = vmatprep.subr.bf16.mxu1 %v2673_v11  ;;  %1943 = vmatprep.mubr.bf16.mxu0 %v3131_v36  ;;  %v2757_v11 = vld [vmem:[#allocation2 + $0x704] ss:$16 sps:$4 sm:$0xff]  }
  0x61   :  { %1984 = vmatprep.mubr.bf16.mxu1 %v3135_v37 }
  0x62   :  { %1914 = vmatpush1.bf16.msra.mxu0 %v2668_v12  ;;  %v2752_v12 = vld [vmem:[#allocation2 + $0x500] ss:$16 sps:$4 sm:$0xff]  }
  0x63   :  { %1955 = vmatpush1.bf16.msra.mxu1 %v2671_v13  ;;  %1915 = vmatprep.subr.bf16.mxu0 %v2676_v14  ;;  %v2755_v13 = vld [vmem:[#allocation2 + $0x700] ss:$16 sps:$4 sm:$0xff]   ;;  %v2764_v14 = vld [vmem:[#allocation2 + $0x8e4] ss:$16 sps:$4 sm:$0xff]  }
  0x64   :  { %1956 = vmatprep.subr.bf16.mxu1 %v2679_v15  ;;  %v2767_v15 = vld [vmem:[#allocation2 + $0xec] ss:$16 sps:$4 sm:$0xff]  }
  0x66   :  { %1916 = vmatpush1.bf16.msra.mxu0 %v2674_v16  ;;  %v3141_v16 = vcombine.low %v3122_v32, %v3122_v32  ;;  %v2783_v32 = vld [vmem:[#allocation2 + $0x88] ss:$16 sps:$4 sm:$0xff]  }
  0x67   :  { %1957 = vmatpush1.bf16.msra.mxu1 %v2677_v17  ;;  %1917 = vmatprep.subr.bf16.mxu0 %v2682_v18  ;;  %v3145_v17 = vcombine.low %v3127_v33, %v3127_v33  ;;  %v2762_v18 = vld [vmem:[#allocation2 + $0x8e0] ss:$16 sps:$4 sm:$0xff]   ;;  %v2788_v33 = vld [vmem:[#allocation2 + $0x864] ss:$16 sps:$4 sm:$0xff]  }
  0x68   :  { %1958 = vmatprep.subr.bf16.mxu1 %v2685_v19  ;;  %v2765_v19 = vld [vmem:[#allocation2 + $0xe8] ss:$16 sps:$4 sm:$0xff]  }
  0x6a   :  { %1918 = vmatpush1.bf16.msra.mxu0 %v2680_v20  ;;  %v2770_v20 = vld [vmem:[#allocation2 + $0x8c4] ss:$16 sps:$4 sm:$0xff]  }
  0x6b   :  { %1959 = vmatpush1.bf16.msra.mxu1 %v2683_v21  ;;  %1919 = vmatprep.subr.bf16.mxu0 %v2688_v22  ;;  %v2773_v21 = vld [vmem:[#allocation2 + $0xcc] ss:$16 sps:$4 sm:$0xff]   ;;  %v2768_v22 = vld [vmem:[#allocation2 + $0x8c0] ss:$16 sps:$4 sm:$0xff]  }
  0x6c   :  { %1960 = vmatprep.subr.bf16.mxu1 %v2691_v23  ;;  %v2771_v23 = vld [vmem:[#allocation2 + $0xc8] ss:$16 sps:$4 sm:$0xff]  }
  0x6e   :  { %1920 = vmatpush1.bf16.msra.mxu0 %v2686_v24  ;;  %v2776_v24 = vld [vmem:[#allocation2 + $0x8a4] ss:$16 sps:$4 sm:$0xff]  }
  0x6f   :  { %1961 = vmatpush1.bf16.msra.mxu1 %v2689_v25  ;;  %1921 = vmatprep.subr.bf16.mxu0 %v2694_v26  ;;  %v2779_v25 = vld [vmem:[#allocation2 + $0xac] ss:$16 sps:$4 sm:$0xff]   ;;  %v3073_v26 = vmov 0  }
  0x70   :  { %1962 = vmatprep.subr.bf16.mxu1 %v2697_v27  ;;  %v2774_v27 = vld [vmem:[#allocation2 + $0x8a0] ss:$16 sps:$4 sm:$0xff]  }
  0x72   :  { %1922 = vmatpush1.bf16.msra.mxu0 %v2692_v28  ;;  %v2777_v28 = vld [vmem:[#allocation2 + $0xa8] ss:$16 sps:$4 sm:$0xff]  }
  0x73   :  { %1963 = vmatpush1.bf16.msra.mxu1 %v2695_v29  ;;  %1923 = vmatprep.subr.bf16.mxu0 %v2700_v30  ;;  %v2782_v29 = vld [vmem:[#allocation2 + $0x884] ss:$16 sps:$4 sm:$0xff]   ;;  %v2785_v30 = vld [vmem:[#allocation2 + $0x8c] ss:$16 sps:$4 sm:$0xff]  }
  0x74   :  { %1964 = vmatprep.subr.bf16.mxu1 %v2703_v31  ;;  %v2780_v31 = vld [vmem:[#allocation2 + $0x880] ss:$16 sps:$4 sm:$0xff]  }
  0x76   :  { %1924 = vmatpush1.bf16.msra.mxu0 %v2698_v34  ;;  %v2791_v34 = vld [vmem:[#allocation2 + $0x6c] ss:$16 sps:$4 sm:$0xff]  }
  0x77   :  { %1965 = vmatpush1.bf16.msra.mxu1 %v2701_v35  ;;  %1925 = vmatprep.subr.bf16.mxu0 %v2706_v38  ;;  %v2786_v35 = vld [vmem:[#allocation2 + $0x860] ss:$16 sps:$4 sm:$0xff]   ;;  %v2794_v38 = vld [vmem:[#allocation2 + $0x844] ss:$16 sps:$4 sm:$0xff]  }
  0x78   :  { %1966 = vmatprep.subr.bf16.mxu1 %v2709_v39  ;;  %v2797_v39 = vld [vmem:[#allocation2 + $0x4c] ss:$16 sps:$4 sm:$0xff]  }
  0x7a   :  { %1926 = vmatpush1.bf16.msra.mxu0 %v2704_v40  ;;  %v2792_v40 = vld [vmem:[#allocation2 + $0x840] ss:$16 sps:$4 sm:$0xff]  }
  0x7b   :  { %1967 = vmatpush1.bf16.msra.mxu1 %v2707_v41  ;;  %1927 = vmatprep.subr.bf16.mxu0 %v2712_v42  ;;  %v2795_v41 = vld [vmem:[#allocation2 + $0x48] ss:$16 sps:$4 sm:$0xff]   ;;  %v2800_v42 = vld [vmem:[#allocation2 + $0x824] ss:$16 sps:$4 sm:$0xff]  }
  0x7c   :  { %1968 = vmatprep.subr.bf16.mxu1 %v2715_v43  ;;  %v2803_v43 = vld [vmem:[#allocation2 + $0x2c] ss:$16 sps:$4 sm:$0xff]  }
  0x7e   :  { %1928 = vmatpush2.bf16.msra.mxu0 %v2710_v44  ;;  %v2798_v44 = vld [vmem:[#allocation2 + $0x820] ss:$16 sps:$4 sm:$0xff]  }
  0x7f   :  { %1969 = vmatpush2.bf16.msra.mxu1 %v2713_v45  ;;  %1929 = vmatprep.subr.bf16.mxu0 %v2718_v46  ;;  %v2801_v45 = vld [vmem:[#allocation2 + $0x28] ss:$16 sps:$4 sm:$0xff]   ;;  %v2806_v46 = vld [vmem:[#allocation2 + $0x804] ss:$16 sps:$4 sm:$0xff]  }
  0x80   :  { %1970 = vmatprep.subr.bf16.mxu1 %v2721_v48  ;;  %v2809_v48 = vld [vmem:[#allocation2 + $0xc] ss:$16 sps:$4 sm:$0xff]  }
  0x82   :  { %1930 = vmatpush2.bf16.msra.mxu0 %v2716_v49  ;;  %v2804_v49 = vld [vmem:[#allocation2 + $0x800] ss:$16 sps:$4 sm:$0xff]  }
  0x83   :  { %1971 = vmatpush2.bf16.msra.mxu1 %v2719_v50  ;;  %1931 = vmatprep.subr.bf16.mxu0 %v2724_v52  ;;  %v2807_v50 = vld [vmem:[#allocation2 + $0x8] ss:$16 sps:$4 sm:$0xff]   ;;  %v2813_v52 = vld [vmem:[#allocation2 + $0x1ec] ss:$16 sps:$4 sm:$0xff]  }
  0x84   :  { %1972 = vmatprep.subr.bf16.mxu1 %v2727_v53  ;;  %v2816_v53 = vld [vmem:[#allocation2 + $0x2ec] ss:$16 sps:$4 sm:$0xff]  }
  0x86   :  { %1932 = vmatpush2.bf16.msra.mxu0 %v2722_v54  ;;  %v3154_v54 = vld [vmem:[%s3184_s0 + $0x20] ss:$0 sps:$4 sm:$0xff]   ;;  %s3074_s0 = smov [#allocation7]  }
  0x87   :  { %1973 = vmatpush2.bf16.msra.mxu1 %v2725_v55  ;;  %1933 = vmatprep.subr.bf16.mxu0 %v2730_v56  ;;  %v2811_v55 = vld [vmem:[#allocation2 + $0x1e8] ss:$16 sps:$4 sm:$0xff]   ;;  %s2249_s5 = sshll.u32 %s3074_s0, 4  ;;  %s2250_s5 = int_to_ptr.vmem [resolvable:$true] %s2249_s5 }
  0x88   :  { %1974 = vmatprep.subr.bf16.mxu1 %v2733_v57  ;;  %v2814_v56 = vld [vmem:[#allocation2 + $0x2e8] ss:$16 sps:$4 sm:$0xff]   ;;  %v2819_v57 = vld [vmem:[#allocation2 + $0x1cc] ss:$16 sps:$4 sm:$0xff]   ;;  %s3043_s6 = scalar_lea.vmem %s2250_s5, 512  ;;  %p3048_p11 = scmp.lt.s32.totalorder %s2250_s5, %s2250_s5 }
  0x89   :  { %p3044_p10 = scmp.ne.s32.totalorder %s2250_s5, %s3043_s6  ;;  %p3049_p12 = scmp.lt.s32.totalorder %s3043_s6, %s3043_s6 }
  0x8a   :  { %1934 = vmatpush2.bf16.msra.mxu0 %v2728_v58  ;;  %v2822_v58 = vld [vmem:[#allocation2 + $0x2cc] ss:$16 sps:$4 sm:$0xff]  }
  0x8b   :  { %1975 = vmatpush2.bf16.msra.mxu1 %v2731_v59  ;;  %1935 = vmatprep.subr.bf16.mxu0 %v2736_v60  ;;  %v2817_v59 = vld [vmem:[#allocation2 + $0x1c8] ss:$16 sps:$4 sm:$0xff]   ;;  %p3050_p13 = por %p3049_p12, %p3048_p11 }
  0x8c   :  { %1976 = vmatprep.subr.bf16.mxu1 %v2739_v61  ;;  %v2820_v60 = vld [vmem:[#allocation2 + $0x2c8] ss:$16 sps:$4 sm:$0xff]   ;;  %v2825_v61 = vld [vmem:[#allocation2 + $0x1ac] ss:$16 sps:$4 sm:$0xff]  }
  0x8d   :  { %p3051_p0 = pnand %p3050_p13, %p3044_p10 }
  0x8e   :  { %1936 = vmatpush2.bf16.msra.mxu0 %v2734_v62  ;;  %v2828_v62 = vld [vmem:[#allocation2 + $0x2ac] ss:$16 sps:$4 sm:$0xff]  }
  0x8f   :  { %1977 = vmatpush2.bf16.msra.mxu1 %v2737_v63  ;;  %1937 = vmatprep.subr.bf16.mxu0 %v2742_v0  ;;  %v2823_v63 = vld [vmem:[#allocation2 + $0x1a8] ss:$16 sps:$4 sm:$0xff]  }
  0x90   :  { %1978 = vmatprep.subr.bf16.mxu1 %v2745_v1  ;;  %v2826_v0 = vld [vmem:[#allocation2 + $0x2a8] ss:$16 sps:$4 sm:$0xff]   ;;  %v2831_v1 = vld [vmem:[#allocation2 + $0x18c] ss:$16 sps:$4 sm:$0xff]  }
  0x92   :  { %1938 = vmatpush2.bf16.msra.mxu0 %v2740_v2  ;;  %v2834_v2 = vld [vmem:[#allocation2 + $0x28c] ss:$16 sps:$4 sm:$0xff]  }
  0x93   :  { %1979 = vmatpush2.bf16.msra.mxu1 %v2743_v3  ;;  %1939 = vmatprep.subr.bf16.mxu0 %v2748_v4  ;;  %v2829_v3 = vld [vmem:[#allocation2 + $0x188] ss:$16 sps:$4 sm:$0xff]  }
  0x94   :  { %1980 = vmatprep.subr.bf16.mxu1 %v2751_v5  ;;  %v2832_v4 = vld [vmem:[#allocation2 + $0x288] ss:$16 sps:$4 sm:$0xff]   ;;  %v2837_v5 = vld [vmem:[#allocation2 + $0x16c] ss:$16 sps:$4 sm:$0xff]  }
  0x96   :  { %1940 = vmatpush2.bf16.msra.mxu0 %v2746_v8  ;;  %v2840_v8 = vld [vmem:[#allocation2 + $0x26c] ss:$16 sps:$4 sm:$0xff]  }
  0x97   :  { %1981 = vmatpush2.bf16.msra.mxu1 %v2749_v9  ;;  %1941 = vmatprep.subr.bf16.mxu0 %v2754_v10  ;;  %v2835_v9 = vld [vmem:[#allocation2 + $0x168] ss:$16 sps:$4 sm:$0xff]   ;;  %v2843_v10 = vld [vmem:[#allocation2 + $0x14c] ss:$16 sps:$4 sm:$0xff]  }
  0x98   :  { %1982 = vmatprep.subr.bf16.mxu1 %v2757_v11  ;;  %v2846_v11 = vld [vmem:[#allocation2 + $0x24c] ss:$16 sps:$4 sm:$0xff]  }
  0x9a   :  { %1942 = vmatpush2.bf16.msra.mxu0 %v2752_v12  ;;  %v2841_v12 = vld [vmem:[#allocation2 + $0x148] ss:$16 sps:$4 sm:$0xff]  }
  0x9b   :  { %1983 = vmatpush2.bf16.msra.mxu1 %v2755_v13  ;;  %1993 = vmatprep.subr.bf16.mxu0 %v2764_v14  ;;  %v2844_v13 = vld [vmem:[#allocation2 + $0x248] ss:$16 sps:$4 sm:$0xff]   ;;  %v2849_v14 = vld [vmem:[#allocation2 + $0x12c] ss:$16 sps:$4 sm:$0xff]  }
  0x9c   :  { %2034 = vmatprep.subr.bf16.mxu1 %v2767_v15  ;;  %v2852_v15 = vld [vmem:[#allocation2 + $0x22c] ss:$16 sps:$4 sm:$0xff]  }
  0x9d   :  { %1944 = vmatmul.mubr.bf16.vlgmr.msra.gmra.mxu0 %v3141_v16 }
  0x9e   :  { %1985 = vmatmul.mubr.bf16.vlgmr.msra.gmra.mxu1 %v3145_v17  ;;  %1994 = vmatpush1.bf16.msra.mxu0 %v2762_v18  ;;  %v2847_v18 = vld [vmem:[#allocation2 + $0x128] ss:$16 sps:$4 sm:$0xff]  }
  0x9f   :  { %2035 = vmatpush1.bf16.msra.mxu1 %v2765_v19  ;;  %1995 = vmatprep.subr.bf16.mxu0 %v2770_v20  ;;  %v2850_v19 = vld [vmem:[#allocation2 + $0x228] ss:$16 sps:$4 sm:$0xff]   ;;  %v2855_v20 = vld [vmem:[#allocation2 + $0x10c] ss:$16 sps:$4 sm:$0xff]  }
  0xa0   :  { %2036 = vmatprep.subr.bf16.mxu1 %v2773_v21  ;;  %2025 = vmatprep.mubr.bf16.mxu0 %v3073_v26  ;;  %v2858_v21 = vld [vmem:[#allocation2 + $0x20c] ss:$16 sps:$4 sm:$0xff]  }
  0xa1   :  { %2066 = vmatprep.mubr.bf16.mxu1 %v3104_v47  ;;  %v2789_v47 = vld [vmem:[#allocation2 + $0x68] ss:$16 sps:$4 sm:$0xff]  }
  0xa2   :  { %1996 = vmatpush1.bf16.msra.mxu0 %v2768_v22  ;;  %v2853_v22 = vld [vmem:[#allocation2 + $0x108] ss:$16 sps:$4 sm:$0xff]  }
  0xa3   :  { %2037 = vmatpush1.bf16.msra.mxu1 %v2771_v23  ;;  %1997 = vmatprep.subr.bf16.mxu0 %v2776_v24  ;;  %v2856_v23 = vld [vmem:[#allocation2 + $0x208] ss:$16 sps:$4 sm:$0xff]   ;;  %v2861_v24 = vld [vmem:[#allocation2 + $0x3ec] ss:$16 sps:$4 sm:$0xff]  }
  0xa4   :  { %2038 = vmatprep.subr.bf16.mxu1 %v2779_v25  ;;  %v2864_v25 = vld [vmem:[#allocation2 + $0x4ec] ss:$16 sps:$4 sm:$0xff]  }
  0xa6   :  { %1998 = vmatpush1.bf16.msra.mxu0 %v2774_v27  ;;  %v2859_v27 = vld [vmem:[#allocation2 + $0x3e8] ss:$16 sps:$4 sm:$0xff]  }
  0xa7   :  { %2039 = vmatpush1.bf16.msra.mxu1 %v2777_v28  ;;  %1999 = vmatprep.subr.bf16.mxu0 %v2782_v29  ;;  %v2862_v28 = vld [vmem:[#allocation2 + $0x4e8] ss:$16 sps:$4 sm:$0xff]   ;;  %v2867_v29 = vld [vmem:[#allocation2 + $0x3cc] ss:$16 sps:$4 sm:$0xff]  }
  0xa8   :  { %2040 = vmatprep.subr.bf16.mxu1 %v2785_v30  ;;  %v2870_v30 = vld [vmem:[#allocation2 + $0x4cc] ss:$16 sps:$4 sm:$0xff]  }
  0xaa   :  { %2000 = vmatpush1.bf16.msra.mxu0 %v2780_v31  ;;  %v2865_v31 = vld [vmem:[#allocation2 + $0x3c8] ss:$16 sps:$4 sm:$0xff]  }
  0xab   :  { %2041 = vmatpush1.bf16.msra.mxu1 %v2783_v32  ;;  %2001 = vmatprep.subr.bf16.mxu0 %v2788_v33  ;;  %v2868_v32 = vld [vmem:[#allocation2 + $0x4c8] ss:$16 sps:$4 sm:$0xff]   ;;  %v2873_v33 = vld [vmem:[#allocation2 + $0x3ac] ss:$16 sps:$4 sm:$0xff]  }
  0xac   :  { %2042 = vmatprep.subr.bf16.mxu1 %v2791_v34  ;;  %v2876_v34 = vld [vmem:[#allocation2 + $0x4ac] ss:$16 sps:$4 sm:$0xff]  }
  0xae   :  { %2002 = vmatpush1.bf16.msra.mxu0 %v2786_v35  ;;  %v2871_v35 = vld [vmem:[#allocation2 + $0x3a8] ss:$16 sps:$4 sm:$0xff]  }
  0xaf   :  { %2043 = vmatpush1.bf16.msra.mxu1 %v2789_v47  ;;  %2003 = vmatprep.subr.bf16.mxu0 %v2794_v38  ;;  %v2874_v47 = vld [vmem:[#allocation2 + $0x4a8] ss:$16 sps:$4 sm:$0xff]   ;;  %v2879_v38 = vld [vmem:[#allocation2 + $0x38c] ss:$16 sps:$4 sm:$0xff]  }
  0xb0   :  { %2044 = vmatprep.subr.bf16.mxu1 %v2797_v39  ;;  %v2882_v39 = vld [vmem:[#allocation2 + $0x48c] ss:$16 sps:$4 sm:$0xff]  }
  0xb2   :  { %2004 = vmatpush1.bf16.msra.mxu0 %v2792_v40  ;;  %v2880_v40 = vld [vmem:[#allocation2 + $0x488] ss:$16 sps:$4 sm:$0xff]  }
  0xb3   :  { %2045 = vmatpush1.bf16.msra.mxu1 %v2795_v41  ;;  %2005 = vmatprep.subr.bf16.mxu0 %v2800_v42  ;;  %v2885_v41 = vld [vmem:[#allocation2 + $0x36c] ss:$16 sps:$4 sm:$0xff]  }
  0xb4   :  { %2046 = vmatprep.subr.bf16.mxu1 %v2803_v43  ;;  %v2888_v42 = vld [vmem:[#allocation2 + $0x46c] ss:$16 sps:$4 sm:$0xff]   ;;  %v2883_v43 = vld [vmem:[#allocation2 + $0x368] ss:$16 sps:$4 sm:$0xff]  }
  0xb6   :  { %2006 = vmatpush1.bf16.msra.mxu0 %v2798_v44  ;;  %v2891_v44 = vld [vmem:[#allocation2 + $0x34c] ss:$16 sps:$4 sm:$0xff]  }
  0xb7   :  { %2047 = vmatpush1.bf16.msra.mxu1 %v2801_v45  ;;  %2007 = vmatprep.subr.bf16.mxu0 %v2806_v46  ;;  %v2894_v45 = vld [vmem:[#allocation2 + $0x44c] ss:$16 sps:$4 sm:$0xff]   ;;  %v2889_v46 = vld [vmem:[#allocation2 + $0x348] ss:$16 sps:$4 sm:$0xff]  }
  0xb8   :  { %2048 = vmatprep.subr.bf16.mxu1 %v2809_v48  ;;  %v2892_v48 = vld [vmem:[#allocation2 + $0x448] ss:$16 sps:$4 sm:$0xff]  }
  0xba   :  { %2008 = vmatpush1.bf16.msra.mxu0 %v2804_v49  ;;  %v2897_v49 = vld [vmem:[#allocation2 + $0x32c] ss:$16 sps:$4 sm:$0xff]  }
  0xbb   :  { %2049 = vmatpush1.bf16.msra.mxu1 %v2807_v50  ;;  %2075 = vmatprep.subr.bf16.mxu0 %v2816_v53  ;;  %v2900_v50 = vld [vmem:[#allocation2 + $0x42c] ss:$16 sps:$4 sm:$0xff]   ;;  %v2898_v53 = vld [vmem:[#allocation2 + $0x428] ss:$16 sps:$4 sm:$0xff]  }
  0xbc   :  { %2050 = vmatprep.subr.bf16.mxu1 %v2813_v52  ;;  %v2895_v52 = vld [vmem:[#allocation2 + $0x328] ss:$16 sps:$4 sm:$0xff]  }
  0xbd   :  { %2026 = vmatmul.mubr.bf16.vlgmr.msra.gmra.mxu0 %v3154_v54 }
  0xbe   :  { %2076 = vmatpush1.bf16.msra.mxu0 %v2814_v56  ;;  %2107 = vmatprep.mubr.bf16.mxu0 %v3109_v51  ;;  %v2838_v51 = vld [vmem:[#allocation2 + $0x268] ss:$16 sps:$4 sm:$0xff]   ;;  %v2906_v56 = vld [vmem:[#allocation2 + $0x40c] ss:$16 sps:$4 sm:$0xff]  }
  0xbf   :  { %2051 = vmatpush2.bf16.msra.mxu1 %v2811_v55  ;;  %2077 = vmatprep.subr.bf16.mxu0 %v2822_v58  ;;  %v2903_v55 = vld [vmem:[#allocation2 + $0x30c] ss:$16 sps:$4 sm:$0xff]   ;;  %v2904_v58 = vld [vmem:[#allocation2 + $0x408] ss:$16 sps:$4 sm:$0xff]  }
  0xc0   :  { %2052 = vmatprep.subr.bf16.mxu1 %v2819_v57  ;;  %v2901_v57 = vld [vmem:[#allocation2 + $0x308] ss:$16 sps:$4 sm:$0xff]  }
  0xc2   :  { %2078 = vmatpush1.bf16.msra.mxu0 %v2820_v60  ;;  %v2912_v60 = vld [vmem:[#allocation2 + $0x6ec] ss:$16 sps:$4 sm:$0xff]  }
  0xc3   :  { %2053 = vmatpush2.bf16.msra.mxu1 %v2817_v59  ;;  %2079 = vmatprep.subr.bf16.mxu0 %v2828_v62  ;;  %v2909_v59 = vld [vmem:[#allocation2 + $0x5ec] ss:$16 sps:$4 sm:$0xff]   ;;  %v2910_v62 = vld [vmem:[#allocation2 + $0x6e8] ss:$16 sps:$4 sm:$0xff]  }
  0xc4   :  { %2054 = vmatprep.subr.bf16.mxu1 %v2825_v61  ;;  %v2907_v61 = vld [vmem:[#allocation2 + $0x5e8] ss:$16 sps:$4 sm:$0xff]  }
  0xc6   :  { %2080 = vmatpush1.bf16.msra.mxu0 %v2826_v0  ;;  %v2918_v0 = vld [vmem:[#allocation2 + $0x6cc] ss:$16 sps:$4 sm:$0xff]  }
  0xc7   :  { %2055 = vmatpush2.bf16.msra.mxu1 %v2823_v63  ;;  %2081 = vmatprep.subr.bf16.mxu0 %v2834_v2  ;;  %v2915_v63 = vld [vmem:[#allocation2 + $0x5cc] ss:$16 sps:$4 sm:$0xff]   ;;  %v2916_v2 = vld [vmem:[#allocation2 + $0x6c8] ss:$16 sps:$4 sm:$0xff]  }
  0xc8   :  { %2056 = vmatprep.subr.bf16.mxu1 %v2831_v1  ;;  %v2913_v1 = vld [vmem:[#allocation2 + $0x5c8] ss:$16 sps:$4 sm:$0xff]  }
  0xca   :  { %2082 = vmatpush1.bf16.msra.mxu0 %v2832_v4  ;;  %v2924_v4 = vld [vmem:[#allocation2 + $0x6ac] ss:$16 sps:$4 sm:$0xff]  }
  0xcb   :  { %2057 = vmatpush2.bf16.msra.mxu1 %v2829_v3  ;;  %2083 = vmatprep.subr.bf16.mxu0 %v2840_v8  ;;  %v2921_v3 = vld [vmem:[#allocation2 + $0x5ac] ss:$16 sps:$4 sm:$0xff]   ;;  %v2922_v8 = vld [vmem:[#allocation2 + $0x6a8] ss:$16 sps:$4 sm:$0xff]  }
  0xcc   :  { %2058 = vmatprep.subr.bf16.mxu1 %v2837_v5  ;;  %v2919_v5 = vld [vmem:[#allocation2 + $0x5a8] ss:$16 sps:$4 sm:$0xff]  }
  0xce   :  { %2084 = vmatpush1.bf16.msra.mxu0 %v2838_v51  ;;  %v2930_v51 = vld [vmem:[#allocation2 + $0x68c] ss:$16 sps:$4 sm:$0xff]  }
  0xcf   :  { %2059 = vmatpush2.bf16.msra.mxu1 %v2835_v9  ;;  %2085 = vmatprep.subr.bf16.mxu0 %v2846_v11  ;;  %v2927_v9 = vld [vmem:[#allocation2 + $0x58c] ss:$16 sps:$4 sm:$0xff]  }
  0xd0   :  { %2060 = vmatprep.subr.bf16.mxu1 %v2843_v10  ;;  %v2928_v10 = vld [vmem:[#allocation2 + $0x688] ss:$16 sps:$4 sm:$0xff]   ;;  %v2933_v11 = vld [vmem:[#allocation2 + $0x56c] ss:$16 sps:$4 sm:$0xff]  }
  0xd2   :  { %2086 = vmatpush1.bf16.msra.mxu0 %v2844_v13  ;;  %v2931_v13 = vld [vmem:[#allocation2 + $0x568] ss:$16 sps:$4 sm:$0xff]  }
  0xd3   :  { %2061 = vmatpush2.bf16.msra.mxu1 %v2841_v12  ;;  %2087 = vmatprep.subr.bf16.mxu0 %v2852_v15  ;;  %v2936_v12 = vld [vmem:[#allocation2 + $0x66c] ss:$16 sps:$4 sm:$0xff]  }
  0xd4   :  { %2062 = vmatprep.subr.bf16.mxu1 %v2849_v14  ;;  %v2939_v14 = vld [vmem:[#allocation2 + $0x54c] ss:$16 sps:$4 sm:$0xff]  }
  0xd5   :  { %v2942_v15 = vld [vmem:[#allocation2 + $0x64c] ss:$16 sps:$4 sm:$0xff]  }
  0xd6   :  { %2088 = vmatpush1.bf16.msra.mxu0 %v2850_v19  ;;  %v2940_v19 = vld [vmem:[#allocation2 + $0x648] ss:$16 sps:$4 sm:$0xff]  }
  0xd7   :  { %2063 = vmatpush2.bf16.msra.mxu1 %v2847_v18  ;;  %2089 = vmatprep.subr.bf16.mxu0 %v2858_v21  ;;  %v2937_v18 = vld [vmem:[#allocation2 + $0x548] ss:$16 sps:$4 sm:$0xff]   ;;  %v2945_v21 = vld [vmem:[#allocation2 + $0x52c] ss:$16 sps:$4 sm:$0xff]  }
  0xd8   :  { %2064 = vmatprep.subr.bf16.mxu1 %v2855_v20  ;;  %v337_v20 = vlaneseq }
  0xda   :  { %2090 = vmatpush1.bf16.msra.mxu0 %v2856_v23  ;;  %v2943_v23 = vld [vmem:[#allocation2 + $0x528] ss:$16 sps:$4 sm:$0xff]  }
  0xdb   :  { %2065 = vmatpush2.bf16.msra.mxu1 %v2853_v22  ;;  %2091 = vmatprep.subr.bf16.mxu0 %v2861_v24  ;;  %v2948_v22 = vld [vmem:[#allocation2 + $0x62c] ss:$16 sps:$4 sm:$0xff]   ;;  %v2946_v24 = vld [vmem:[#allocation2 + $0x628] ss:$16 sps:$4 sm:$0xff]  }
  0xdc   :  { %2116 = vmatprep.subr.bf16.mxu1 %v2864_v25  ;;  %v3162_v25 = vshrl.u32 %v337_v20, 7 }
  0xde   :  { %2067 = vmatmul.mubr.bf16.vlgmr.msra.gmra.mxu1 %v3113_v6  ;;  %2092 = vmatpush2.bf16.msra.mxu0 %v2859_v27  ;;  %v2877_v6 = vld [vmem:[#allocation2 + $0x388] ss:$16 sps:$4 sm:$0xff]   ;;  %v2951_v27 = vld [vmem:[#allocation2 + $0x50c] ss:$16 sps:$4 sm:$0xff]  }
  0xdf   :  { %2117 = vmatpush1.bf16.msra.mxu1 %v2862_v28  ;;  %2093 = vmatprep.subr.bf16.mxu0 %v2867_v29  ;;  %v2954_v28 = vld [vmem:[#allocation2 + $0x60c] ss:$16 sps:$4 sm:$0xff]   ;;  %v2949_v29 = vld [vmem:[#allocation2 + $0x508] ss:$16 sps:$4 sm:$0xff]  }
  0xe0   :  { %2118 = vmatprep.subr.bf16.mxu1 %v2870_v30  ;;  %2148 = vmatprep.mubr.bf16.mxu1 %v3131_v36  ;;  %v2886_v36 = vld [vmem:[#allocation2 + $0x468] ss:$16 sps:$4 sm:$0xff]  }
  0xe1   :  { %v2952_v30 = vld [vmem:[#allocation2 + $0x608] ss:$16 sps:$4 sm:$0xff]  }
  0xe2   :  { %2094 = vmatpush2.bf16.msra.mxu0 %v2865_v31  ;;  %v339_v31 = vsub.s32 0, %v3162_v25 }
  0xe3   :  { %2119 = vmatpush1.bf16.msra.mxu1 %v2868_v32  ;;  %2095 = vmatprep.subr.bf16.mxu0 %v2873_v33  ;;  %v3165_v32 = vld [vmem:[#allocation5] sm:$0xf]  ;;  %v2957_v33 = vld [vmem:[#allocation2 + $0x7ec] ss:$16 sps:$4 sm:$0xff]  }
  0xe4   :  { %2120 = vmatprep.subr.bf16.mxu1 %v2876_v34  ;;  %v2960_v34 = vld [vmem:[#allocation2 + $0x8ec] ss:$16 sps:$4 sm:$0xff]  }
  0xe6   :  { %2096 = vmatpush2.bf16.msra.mxu0 %v2871_v35  ;;  %v343_v35 = vsub.s32 1, %v3162_v25 }
  0xe7   :  { %2121 = vmatpush1.bf16.msra.mxu1 %v2874_v47  ;;  %2097 = vmatprep.subr.bf16.mxu0 %v2879_v38  ;;  %v340_v47 = vrot.slane %v3165_v32, %v339_v31  ;;  %v2955_v38 = vld [vmem:[#allocation2 + $0x7e8] ss:$16 sps:$4 sm:$0xff]  }
  0xe8   :  { %2122 = vmatprep.subr.bf16.mxu1 %v2882_v39  ;;  %v2958_v39 = vld [vmem:[#allocation2 + $0x8e8] ss:$16 sps:$4 sm:$0xff]  }
  0xea   :  { %2098 = vmatpush2.bf16.msra.mxu0 %v2877_v6  ;;  %v2963_v6 = vld [vmem:[#allocation2 + $0x7cc] ss:$16 sps:$4 sm:$0xff]  }
  0xeb   :  { %2123 = vmatpush1.bf16.msra.mxu1 %v2880_v40  ;;  %2099 = vmatprep.subr.bf16.mxu0 %v2885_v41  ;;  %v2966_v40 = vld [vmem:[#allocation2 + $0x8cc] ss:$16 sps:$4 sm:$0xff]   ;;  %v344_v41 = vrot.slane %v3165_v32, %v343_v35 }
  0xec   :  { %2124 = vmatprep.subr.bf16.mxu1 %v2888_v42 }
  0xee   :  { %2100 = vmatpush2.bf16.msra.mxu0 %v2883_v43 }
  0xef   :  { %2125 = vmatpush1.bf16.msra.mxu1 %v2886_v36  ;;  %2101 = vmatprep.subr.bf16.mxu0 %v2891_v44  ;;  %v2961_v44 = vld [vmem:[#allocation2 + $0x7c8] ss:$16 sps:$4 sm:$0xff]  }
  0xf0   :  { %2126 = vmatprep.subr.bf16.mxu1 %v2894_v45  ;;  %v2964_v45 = vld [vmem:[#allocation2 + $0x8c8] ss:$16 sps:$4 sm:$0xff]  }
  0xf2   :  { %2102 = vmatpush2.bf16.msra.mxu0 %v2889_v46 }
  0xf3   :  { %2127 = vmatpush1.bf16.msra.mxu1 %v2892_v48  ;;  %2103 = vmatprep.subr.bf16.mxu0 %v2897_v49  ;;  %v2969_v49 = vld [vmem:[#allocation2 + $0x7ac] ss:$16 sps:$4 sm:$0xff]  }
  0xf4   :  { %2128 = vmatprep.subr.bf16.mxu1 %v2900_v50  ;;  %v2972_v50 = vld [vmem:[#allocation2 + $0x8ac] ss:$16 sps:$4 sm:$0xff]  }
  0xf6   :  { %2104 = vmatpush2.bf16.msra.mxu0 %v2895_v52 }
  0xf7   :  { %2129 = vmatpush1.bf16.msra.mxu1 %v2898_v53  ;;  %2105 = vmatprep.subr.bf16.mxu0 %v2903_v55 }
  0xf8   :  { %2130 = vmatprep.subr.bf16.mxu1 %v2906_v56 }
  0xfa   :  { %2106 = vmatpush2.bf16.msra.mxu0 %v2901_v57 }
  0xfb   :  { %2131 = vmatpush1.bf16.msra.mxu1 %v2904_v58  ;;  %2157 = vmatprep.subr.bf16.mxu0 %v2912_v60  ;;  %v2970_v58 = vld [vmem:[#allocation2 + $0x8a8] ss:$16 sps:$4 sm:$0xff]  }
  0xfc   :  { %2132 = vmatprep.subr.bf16.mxu1 %v2909_v59 }
  0xfd   :  { %2108 = vmatmul.mubr.bf16.vlgmr.msra.gmra.mxu0 %v3115_v7  ;;  %v2925_v7 = vld [vmem:[#allocation2 + $0x588] ss:$16 sps:$4 sm:$0xff]  }
  0xfe   :  { %2158 = vmatpush1.bf16.msra.mxu0 %v2910_v62  ;;  %2189 = vmatprep.mubr.bf16.mxu0 %v3135_v37  ;;  %v2934_v37 = vld [vmem:[#allocation2 + $0x668] ss:$16 sps:$4 sm:$0xff]   ;;  %v2978_v62 = vld [vmem:[#allocation2 + $0x88c] ss:$16 sps:$4 sm:$0xff]  }
  0xff   :  { %2133 = vmatpush2.bf16.msra.mxu1 %v2907_v61  ;;  %2159 = vmatprep.subr.bf16.mxu0 %v2918_v0  ;;  %v2975_v61 = vld [vmem:[#allocation2 + $0x78c] ss:$16 sps:$4 sm:$0xff]   ;;  %v2976_v0 = vld [vmem:[#allocation2 + $0x888] ss:$16 sps:$4 sm:$0xff]  }
 0x100   :  { %2134 = vmatprep.subr.bf16.mxu1 %v2915_v63  ;;  %v2973_v63 = vld [vmem:[#allocation2 + $0x788] ss:$16 sps:$4 sm:$0xff]  }
 0x102   :  { %2160 = vmatpush1.bf16.msra.mxu0 %v2916_v2  ;;  %v2979_v2 = vld [vmem:[#allocation2 + $0x768] ss:$16 sps:$4 sm:$0xff]  }
 0x103   :  { %2135 = vmatpush2.bf16.msra.mxu1 %v2913_v1  ;;  %2161 = vmatprep.subr.bf16.mxu0 %v2924_v4  ;;  %v2984_v1 = vld [vmem:[#allocation2 + $0x86c] ss:$16 sps:$4 sm:$0xff]  }
 0x104   :  { %2136 = vmatprep.subr.bf16.mxu1 %v2921_v3  ;;  %v2982_v3 = vld [vmem:[#allocation2 + $0x868] ss:$16 sps:$4 sm:$0xff]   ;;  %v2987_v4 = vld [vmem:[#allocation2 + $0x74c] ss:$16 sps:$4 sm:$0xff]  }
 0x106   :  { %2162 = vmatpush1.bf16.msra.mxu0 %v2922_v8  ;;  %v2985_v8 = vld [vmem:[#allocation2 + $0x748] ss:$16 sps:$4 sm:$0xff]  }
 0x107   :  { %2137 = vmatpush2.bf16.msra.mxu1 %v2919_v5  ;;  %2163 = vmatprep.subr.bf16.mxu0 %v2930_v51  ;;  %v2990_v5 = vld [vmem:[#allocation2 + $0x84c] ss:$16 sps:$4 sm:$0xff]  }
 0x108   :  { %2138 = vmatprep.subr.bf16.mxu1 %v2927_v9  ;;  %v2988_v9 = vld [vmem:[#allocation2 + $0x848] ss:$16 sps:$4 sm:$0xff]   ;;  %v2993_v51 = vld [vmem:[#allocation2 + $0x72c] ss:$16 sps:$4 sm:$0xff]  }
 0x10a   :  { %2164 = vmatpush1.bf16.msra.mxu0 %v2928_v10  ;;  %v2991_v10 = vld [vmem:[#allocation2 + $0x728] ss:$16 sps:$4 sm:$0xff]  }
 0x10b   :  { %2139 = vmatpush2.bf16.msra.mxu1 %v2925_v7  ;;  %2165 = vmatprep.subr.bf16.mxu0 %v2936_v12  ;;  %v2996_v7 = vld [vmem:[#allocation2 + $0x82c] ss:$16 sps:$4 sm:$0xff]  }
 0x10c   :  { %2140 = vmatprep.subr.bf16.mxu1 %v2933_v11  ;;  %v2994_v11 = vld [vmem:[#allocation2 + $0x828] ss:$16 sps:$4 sm:$0xff]   ;;  %v2999_v12 = vld [vmem:[#allocation2 + $0x70c] ss:$16 sps:$4 sm:$0xff]  }
 0x10e   :  { %2166 = vmatpush1.bf16.msra.mxu0 %v2934_v37  ;;  %v2997_v37 = vld [vmem:[#allocation2 + $0x708] ss:$16 sps:$4 sm:$0xff]  }
 0x10f   :  { %2141 = vmatpush2.bf16.msra.mxu1 %v2931_v13  ;;  %2167 = vmatprep.subr.bf16.mxu0 %v2942_v15  ;;  %v3002_v13 = vld [vmem:[#allocation2 + $0x80c] ss:$16 sps:$4 sm:$0xff]  }
 0x110   :  { %2142 = vmatprep.subr.bf16.mxu1 %v2939_v14  ;;  %v3000_v14 = vld [vmem:[#allocation2 + $0x808] ss:$16 sps:$4 sm:$0xff]  }
 0x112   :  { %2168 = vmatpush1.bf16.msra.mxu0 %v2940_v19 }
 0x113   :  { %2143 = vmatpush2.bf16.msra.mxu1 %v2937_v18  ;;  %2169 = vmatprep.subr.bf16.mxu0 %v2948_v22 }
 0x114   :  { %2144 = vmatprep.subr.bf16.mxu1 %v2945_v21 }
 0x116   :  { %2170 = vmatpush1.bf16.msra.mxu0 %v2946_v24 }
 0x117   :  { %2145 = vmatpush2.bf16.msra.mxu1 %v2943_v23  ;;  %2171 = vmatprep.subr.bf16.mxu0 %v2954_v28 }
 0x118   :  { %2146 = vmatprep.subr.bf16.mxu1 %v2951_v27 }
 0x11a   :  { %2172 = vmatpush1.bf16.msra.mxu0 %v2952_v30 }
 0x11b   :  { %2147 = vmatpush2.bf16.msra.mxu1 %v2949_v29  ;;  %2173 = vmatprep.subr.bf16.mxu0 %v2957_v33 }
 0x11c   :  { %2198 = vmatprep.subr.bf16.mxu1 %v2960_v34 }
 0x11d   :  { %v1863_v42 = vpop.f32.mrf.mxu0 }
 0x11e   :  { %v1904_v43 = vpop.f32.mrf.mxu1  ;;  %2149 = vmatmul.mubr.bf16.vlgmr.msra.gmra.mxu1 %v3141_v16  ;;  %v1864_v36 = vadd.f32 %v1863_v42, %v340_v47  ;;  %2174 = vmatpush2.bf16.msra.mxu0 %v2955_v38  ;;  %v2967_v16 = vld [vmem:[#allocation2 + $0x7a8] ss:$16 sps:$4 sm:$0xff]  }
 0x11f   :  { %2199 = vmatpush1.bf16.msra.mxu1 %v2958_v39  ;;  %v1865_v46 = vpop.f32.mrf.mxu0  ;;  %2175 = vmatprep.subr.bf16.mxu0 %v2963_v6 }
 0x120   :  { %v1906_v48 = vpop.f32.mrf.mxu1  ;;  %2200 = vmatprep.subr.bf16.mxu1 %v2966_v40  ;;  %v3171_v52 = vadd.f32 %v1904_v43, %v1864_v36  ;;  %v1866_v53 = vadd.f32 %v1865_v46, %v344_v41  ;;  %2230 = vmatprep.mubr.bf16.mxu1 %v3073_v26  ;;  %v2981_v26 = vld [vmem:[#allocation2 + $0x76c] ss:$16 sps:$4 sm:$0xff]  }
 0x121   :  { %v1867_v55 = vpop.f32.mrf.mxu0 }
 0x122   :  { %v1908_v56 = vpop.f32.mrf.mxu1  ;;  %v1907_v57 = vadd.f32 %v1906_v48, %v1866_v53  ;;  %2176 = vmatpush2.bf16.msra.mxu0 %v2961_v44  ;;  %v347_v48 = vsub.s32 2, %v3162_v25 }
 0x123   :  { %2201 = vmatpush1.bf16.msra.mxu1 %v2964_v45  ;;  %v1868_v59 = vpop.f32.mrf.mxu0  ;;  %2177 = vmatprep.subr.bf16.mxu0 %v2969_v49  ;;  %v351_v49 = vsub.s32 3, %v3162_v25 }
 0x124   :  { %v1909_v60 = vpop.f32.mrf.mxu1  ;;  %2202 = vmatprep.subr.bf16.mxu1 %v2972_v50  ;;  %v348_v50 = vrot.slane %v3165_v32, %v347_v48 }
 0x126   :  { %2178 = vmatpush2.bf16.msra.mxu0 %v2967_v16 }
 0x127   :  { %2203 = vmatpush1.bf16.msra.mxu1 %v2970_v58  ;;  %2179 = vmatprep.subr.bf16.mxu0 %v2975_v61 }
 0x128   :  { %2204 = vmatprep.subr.bf16.mxu1 %v2978_v62 }
 0x12a   :  { %2180 = vmatpush2.bf16.msra.mxu0 %v2973_v63 }
 0x12b   :  { %2205 = vmatpush1.bf16.msra.mxu1 %v2976_v0  ;;  %2181 = vmatprep.subr.bf16.mxu0 %v2981_v26 }
 0x12c   :  { %2206 = vmatprep.subr.bf16.mxu1 %v2984_v1 }
 0x12e   :  { %2182 = vmatpush2.bf16.msra.mxu0 %v2979_v2 }
 0x12f   :  { %2207 = vmatpush1.bf16.msra.mxu1 %v2982_v3  ;;  %2183 = vmatprep.subr.bf16.mxu0 %v2987_v4 }
 0x130   :  { %2208 = vmatprep.subr.bf16.mxu1 %v2990_v5 }
 0x132   :  { %2184 = vmatpush2.bf16.msra.mxu0 %v2985_v8 }
 0x133   :  { %2209 = vmatpush1.bf16.msra.mxu1 %v2988_v9  ;;  %2185 = vmatprep.subr.bf16.mxu0 %v2993_v51 }
 0x134   :  { %2210 = vmatprep.subr.bf16.mxu1 %v2996_v7 }
 0x136   :  { %2186 = vmatpush2.bf16.msra.mxu0 %v2991_v10 }
 0x137   :  { %2211 = vmatpush1.bf16.msra.mxu1 %v2994_v11  ;;  %2187 = vmatprep.subr.bf16.mxu0 %v2999_v12 }
 0x138   :  { %2212 = vmatprep.subr.bf16.mxu1 %v3002_v13 }
 0x13a   :  { %2188 = vmatpush2.bf16.msra.mxu0 %v2997_v37 }
 0x13b   :  { %2213 = vmatpush1.bf16.msra.mxu1 %v3000_v14 }
 0x13d   :  { %2190 = vmatmul.mubr.bf16.vlgmr.msra.gmra.mxu0 %v3145_v17 }
 0x13e   :  { %2231 = vmatmul.mubr.bf16.vlgmr.msra.gmra.mxu1 %v3154_v54 }
 0x15d   :  { %v1945_v15 = vpop.f32.mrf.mxu0 }
 0x15e   :  { %v1986_v18 = vpop.f32.mrf.mxu1  ;;  %v1946_v27 = vadd.f32 %v1945_v15, %v3171_v52  ;;  %v352_v52 = vrot.slane %v3165_v32, %v351_v49 }
 0x15f   :  { %v1947_v19 = vpop.f32.mrf.mxu0 }
 0x160   :  { %v1988_v20 = vpop.f32.mrf.mxu1  ;;  %v1948_v28 = vadd.f32 %v1947_v19, %v1907_v57  ;;  %v1987_v29 = vadd.f32 %v1986_v18, %v1946_v27 }
 0x161   :  { %v1949_v21 = vpop.f32.mrf.mxu0 }
 0x162   :  { %v1990_v22 = vpop.f32.mrf.mxu1  ;;  %v1989_v31 = vadd.f32 %v1988_v20, %v1948_v28 }
 0x163   :  { %v1950_v23 = vpop.f32.mrf.mxu0 }
 0x164   :  { %v1991_v24 = vpop.f32.mrf.mxu1 }
 0x17d   :  { %v2027_v30 = vpop.f32.mrf.mxu0 }
 0x17e   :  { %v2028_v33 = vadd.f32 %v2027_v30, %v1987_v29 }
 0x17f   :  { %v2029_v34 = vpop.f32.mrf.mxu0 }
 0x180   :  { %2239 = vst [vmem:[#allocation7] sm:$0xff] %v2028_v33  ;;  %v2030_v17 = vadd.f32 %v2029_v34, %v1989_v31 }
 0x181   :  { %v2031_v35 = vpop.f32.mrf.mxu0 }
 0x182   :  { %2240 = vst [vmem:[#allocation7 + $0x8] sm:$0xff] %v2030_v17 }
 0x183   :  { %v2032_v54 = vpop.f32.mrf.mxu0 }
 0x19e   :  { %v2068_v47 = vpop.f32.mrf.mxu1 }
 0x19f   :  { %v2069_v53 = vadd.f32 %v2068_v47, %v348_v50 }
 0x1a0   :  { %v2070_v38 = vpop.f32.mrf.mxu1 }
 0x1a1   :  { %v2071_v55 = vadd.f32 %v2070_v38, %v352_v52 }
 0x1a2   :  { %v2072_v39 = vpop.f32.mrf.mxu1 }
 0x1a4   :  { %v2073_v6 = vpop.f32.mrf.mxu1 }
 0x1bd   :  { %v2109_v40 = vpop.f32.mrf.mxu0 }
 0x1be   :  { %v2110_v56 = vadd.f32 %v2109_v40, %v2069_v53 }
 0x1bf   :  { %v2111_v41 = vpop.f32.mrf.mxu0 }
 0x1c0   :  { %v2112_v57 = vadd.f32 %v2111_v41, %v2071_v55 }
 0x1c1   :  { %v2113_v42 = vpop.f32.mrf.mxu0 }
 0x1c3   :  { %v2114_v43 = vpop.f32.mrf.mxu0 }
 0x1de   :  { %v2150_v36 = vpop.f32.mrf.mxu1 }
 0x1df   :  { %v2151_v16 = vadd.f32 %v2150_v36, %v2110_v56 }
 0x1e0   :  { %v2152_v44 = vpop.f32.mrf.mxu1 }
 0x1e1   :  { %v2153_v60 = vadd.f32 %v2152_v44, %v2112_v57 }
 0x1e2   :  { %v2154_v45 = vpop.f32.mrf.mxu1 }
 0x1e4   :  { %v2155_v46 = vpop.f32.mrf.mxu1 }
 0x1fd   :  { %v2191_v58 = vpop.f32.mrf.mxu0 }
 0x1fe   :  { %v2232_v59 = vpop.f32.mrf.mxu1  ;;  %v2192_v61 = vadd.f32 %v2191_v58, %v2151_v16 }
 0x1ff   :  { %v2193_v62 = vpop.f32.mrf.mxu0 }
 0x200   :  { %v2234_v63 = vpop.f32.mrf.mxu1  ;;  %v2233_v0 = vadd.f32 %v2232_v59, %v2192_v61  ;;  %v2194_v26 = vadd.f32 %v2193_v62, %v2153_v60 }
 0x201   :  { %v2195_v25 = vpop.f32.mrf.mxu0 }
 0x202   :  { %v2236_v1 = vpop.f32.mrf.mxu1  ;;  %2241 = vst [vmem:[#allocation7 + $0x10] sm:$0xff] %v2233_v0  ;;  %v2235_v2 = vadd.f32 %v2234_v63, %v2194_v26 }
 0x203   :  { %v2196_v32 = vpop.f32.mrf.mxu0 }
 0x204   :  { %v2237_v3 = vpop.f32.mrf.mxu1  ;;  %2242 = vst [vmem:[#allocation7 + $0x18] sm:$0xff] %v2235_v2 }
 0x205   :  { %3054 = shalt.err (!%p3051_p0)
}
 0x206   :  { %2252 = dma.vmem_to_hbm [thread:$0]  %s2250_s5, 512, %s3187_s3, [#allocation4]  }
 0x207   :  { %3067 = dma.done.wait [#allocation4], 512  }
 0x208   :  { %3068 = vsyncadd [#allocation4], 4294966784 }
 0x209   :  { %2256 = vsyncpa [#allocation3], 1 }
 0x20a   :  { %2257 = vsyncpa [#allocation6], 1 }
 0x20b   :  { %2258 = vsyncpa [#allocation4], 1 }

</bundles_post_ra>
